<compile_context>
chip_gen: v5e
topology: v5e:2x2
jax: 0.10.0
libtpu: 0.0.40
codegen_flags: <defaults>
</compile_context>

<pallas_src>
import math

import jax
import jax.numpy as jnp
from jax.experimental import pallas as pl
from jax.experimental.pallas import tpu as pltpu


_SMEM = pl.BlockSpec(memory_space=pltpu.MemorySpace.SMEM)
_VMEM_LIMIT = 32 * 1024 * 1024            # safe on v5e/v6e (128 MiB) and v7x (64 MiB)
_DEFAULT_BLOCK_BYTES = 2 * 1024 * 1024    # per-array, per-buffer; can be raised on 128 MiB parts


# ---------------------------------------------------------------------------
# kernels: quant_output / bitwidth are static module config, feature_frac is not
# (it arrives via the f32[4] SMEM params ref  [2^frac, 2^-frac, qmin, qmax]).
# ---------------------------------------------------------------------------
def _quant(z, q_ref, quant_output):
    if not quant_output:
        return z
    scale, inv_scale, qmin, qmax = q_ref[0], q_ref[1], q_ref[2], q_ref[3]
    # floor + clamp + dequant; scale / inv_scale are exact powers of two, so the
    # reciprocal multiply is bit-identical to the reference division.
    return jnp.clip(jnp.floor(z * scale), qmin, qmax) * inv_scale


def _make_full_kernel(quant_output):
    def kernel(q_ref, a_ref, b_ref, o_ref):
        z = a_ref[...].astype(jnp.float32) * b_ref[...].astype(jnp.float32)
        o_ref[...] = _quant(z, q_ref, quant_output).astype(o_ref.dtype)
    return kernel


def _make_scalar_kernel(quant_output):
    def kernel(q_ref, s_ref, a_ref, o_ref):
        z = a_ref[...].astype(jnp.float32) * s_ref[0]          # scalar scale from SMEM
        o_ref[...] = _quant(z, q_ref, quant_output).astype(o_ref.dtype)
    return kernel


def _make_rowscale_kernel(quant_output):
    def kernel(q_ref, a_ref, s_ref, o_ref):
        z = a_ref[...].astype(jnp.float32) * s_ref[...]        # (tr,tk) * (tr,1) broadcast
        o_ref[...] = _quant(z, q_ref, quant_output).astype(o_ref.dtype)
    return kernel


# ---------------------------------------------------------------------------
# layout helpers
# ---------------------------------------------------------------------------
def _lane_layout(total):
    """Pick a lane width (multiple of 128) that divides `total`; pad only as a fallback."""
    for k in range(16, 0, -1):                      # widest lane <= 2048 that divides
        lane = 128 * k
        if total % lane == 0:
            return lane, total
    # TODO(synk): mask the tail block in-kernel instead of padding (the pad/slice each
    # cost one extra pass over the operand; only hit when total has no 128-divisor).
    lane = 512 if total >= 512 else 128
    return lane, ((total + lane - 1) // lane) * lane


def _to_2d(x, lane, padded):
    flat = x.reshape(-1)
    if padded != flat.shape[0]:
        flat = jnp.pad(flat, (0, padded - flat.shape[0]))
    return flat.reshape(padded // lane, lane)


def _block_rows(rows, lane, itemsizes, block_bytes):
    budget = block_bytes // (lane * max(itemsizes))
    align = 8 * (4 // min(itemsizes))               # 8 rows f32, 16 bf16, 32 int8
    tm = max(align, (budget // align) * align)
    return rows if rows <= tm else tm


def _mosaic_params(n_axes):
    return pltpu.CompilerParams(
        dimension_semantics=("parallel",) * n_axes,   # megacore-shardable on v7x
        vmem_limit_bytes=_VMEM_LIMIT)


# ---------------------------------------------------------------------------
# pallas_call paths
# ---------------------------------------------------------------------------
def _run_full(a2, b2, qparams, out_dtype, quant_output, block_bytes, total):
    rows, lane = a2.shape
    out_item = jnp.dtype(out_dtype).itemsize
    tm = _block_rows(rows, lane, (a2.dtype.itemsize, b2.dtype.itemsize, out_item), block_bytes)
    grid = (-(-rows // tm),)
    return pl.pallas_call(
        _make_full_kernel(quant_output),
        out_shape=jax.ShapeDtypeStruct((rows, lane), out_dtype),
        grid=grid,
        in_specs=[_SMEM,
                  pl.BlockSpec((tm, lane), lambda i: (i, 0)),
                  pl.BlockSpec((tm, lane), lambda i: (i, 0))],
        out_specs=pl.BlockSpec((tm, lane), lambda i: (i, 0)),
        compiler_params=_mosaic_params(1),
        cost_estimate=pl.CostEstimate(
            flops=4 * total, transcendentals=0,
            bytes_accessed=a2.nbytes + b2.nbytes + rows * lane * out_item),
    )(qparams, a2, b2)


def _run_scalar(a2, sval, qparams, out_dtype, quant_output, block_bytes, total):
    rows, lane = a2.shape
    out_item = jnp.dtype(out_dtype).itemsize
    tm = _block_rows(rows, lane, (a2.dtype.itemsize, out_item), block_bytes)
    grid = (-(-rows // tm),)
    return pl.pallas_call(
        _make_scalar_kernel(quant_output),
        out_shape=jax.ShapeDtypeStruct((rows, lane), out_dtype),
        grid=grid,
        in_specs=[_SMEM, _SMEM,
                  pl.BlockSpec((tm, lane), lambda i: (i, 0))],
        out_specs=pl.BlockSpec((tm, lane), lambda i: (i, 0)),
        compiler_params=_mosaic_params(1),
        cost_estimate=pl.CostEstimate(
            flops=4 * total, transcendentals=0,
            bytes_accessed=a2.nbytes + rows * lane * out_item),
    )(qparams, sval, a2)


def _run_rows(a2, srows, qparams, out_dtype, quant_output, block_bytes):
    R, K = a2.shape
    out_item = jnp.dtype(out_dtype).itemsize
    tk = K if K <= 2048 else 2048
    tr = _block_rows(R, tk, (a2.dtype.itemsize, out_item), block_bytes)
    grid = (-(-R // tr), -(-K // tk))
    return pl.pallas_call(
        _make_rowscale_kernel(quant_output),
        out_shape=jax.ShapeDtypeStruct((R, K), out_dtype),
        grid=grid,
        in_specs=[_SMEM,
                  pl.BlockSpec((tr, tk), lambda i, j: (i, j)),
                  pl.BlockSpec((tr, 1), lambda i, j: (i, 0))],
        out_specs=pl.BlockSpec((tr, tk), lambda i, j: (i, j)),
        compiler_params=_mosaic_params(2),
        cost_estimate=pl.CostEstimate(
            flops=4 * R * K, transcendentals=0,
            bytes_accessed=a2.nbytes + srows.nbytes + R * K * out_item),
    )(qparams, a2, srows)


# ---------------------------------------------------------------------------
# public wrapper
# ---------------------------------------------------------------------------
def _quant_params(feature_frac, bitwidth):
    """f32[4] = [2^frac, 2^-frac, qmin, qmax]; frac may be a traced value."""
    frac = jnp.asarray(feature_frac, dtype=jnp.int32).reshape(())
    one = jnp.float32(1.0)
    scale = jnp.ldexp(one, frac)            # exactly 2^frac
    inv_scale = jnp.ldexp(one, -frac)       # exactly 2^-frac
    qmin = jnp.float32(-(2 ** (bitwidth - 1)))
    qmax = jnp.float32(2 ** (bitwidth - 1) - 1)
    return jnp.stack([scale, inv_scale, qmin, qmax]).astype(jnp.float32)


def quantized_scale_by_tensor(x0, x1, feature_frac, bitwidth=8, quant_output=True,
                              block_bytes=_DEFAULT_BLOCK_BYTES):
    """Forward of QuantizedScaleByTensor: fake-quantized x0 * x1 (broadcasting)."""
    assert bitwidth in (8, 16), f"bitwidth should be 8 or 16, got {bitwidth}"
    x0 = jnp.asarray(x0)
    x1 = jnp.asarray(x1)
    out_shape = jnp.broadcast_shapes(x0.shape, x1.shape)
    out_dtype = jnp.result_type(x0.dtype, x1.dtype)
    qparams = _quant_params(feature_frac, bitwidth)
    total = math.prod(out_shape)

    def _full(a, b):
        lane, padded = _lane_layout(total)
        out2 = _run_full(_to_2d(a, lane, padded), _to_2d(b, lane, padded),
                         qparams, out_dtype, quant_output, block_bytes, total)
        out = out2.reshape(-1)
        if padded != total:
            out = out[:total]
        return out.reshape(out_shape)

    # --- path selection: never materialize the broadcast of the small operand ---
    if x0.shape == x1.shape:
        return _full(x0, x1)

    big, small = (x0, x1) if x0.size >= x1.size else (x1, x0)
    if big.shape != tuple(out_shape):
        # Both operands are partial broadcasts (rare for this module).
        # TODO(synk): stream both un-broadcast operands with per-axis index maps.
        return _full(jnp.broadcast_to(x0, out_shape), jnp.broadcast_to(x1, out_shape))

    if small.size == 1:
        # scalar scale: lives in SMEM, only the big operand streams from HBM
        lane, padded = _lane_layout(total)
        sval = small.reshape((1,)).astype(jnp.float32)
        out2 = _run_scalar(_to_2d(big, lane, padded), sval, qparams, out_dtype,
                           quant_output, block_bytes, total)
        out = out2.reshape(-1)
        if padded != total:
            out = out[:total]
        return out.reshape(out_shape)

    # per-channel / per-row scale: small operand is constant over the trailing dims
    rank = len(out_shape)
    s_shape = (1,) * (rank - small.ndim) + tuple(small.shape)
    nz = [d for d in range(rank) if s_shape[d] != 1]
    p = (nz[-1] + 1) if nz else 0
    R = math.prod(out_shape[:p])
    K = math.prod(out_shape[p:])
    if p > 0 and K >= 8:
        # tiny (R,1) side input (e.g. N*C per-channel scales), broadcast in-kernel
        srows = jnp.broadcast_to(small.reshape(s_shape[:p]),
                                 out_shape[:p]).reshape(R, 1).astype(jnp.float32)
        out2 = _run_rows(big.reshape(R, K), srows, qparams, out_dtype,
                         quant_output, block_bytes)
        return out2.reshape(out_shape)

    # TODO(synk): trailing-dim broadcast (e.g. (N,C,H,W) * (W,)) — fall back for now.
    return _full(jnp.broadcast_to(x0, out_shape), jnp.broadcast_to(x1, out_shape))


# ---------------------------------------------------------------------------
# pure-JAX reference with identical semantics
# ---------------------------------------------------------------------------
def _reference(x0, x1, feature_frac, bitwidth=8, quant_output=True):
    x0 = jnp.asarray(x0)
    x1 = jnp.asarray(x1)
    out_dtype = jnp.result_type(x0.dtype, x1.dtype)
    z = x0.astype(jnp.float32) * x1.astype(jnp.float32)
    if quant_output:
        s = 2.0 ** int(feature_frac)
        qmin = -(2 ** (bitwidth - 1))
        qmax = 2 ** (bitwidth - 1) - 1
        z = jnp.clip(jnp.floor(z * s), qmin, qmax) / s
    return z.astype(out_dtype)


if __name__ == "__main__":
    key = jax.random.PRNGKey(0)
    k0, k1, k2, k3 = jax.random.split(key, 4)

    # Small NCHW shapes consistent with the module (activations * scale tensor).
    N, C, H, W = 2, 4, 16, 16
    x0 = jax.random.normal(k0, (N, C, H, W), dtype=jnp.float32)
    x1 = jax.random.normal(k1, (N, C, H, W), dtype=jnp.float32) * 0.5
    x1_chan = jax.random.normal(k2, (1, C, 1, 1), dtype=jnp.float32) * 0.5
    x1_scalar = jax.random.normal(k3, (), dtype=jnp.float32) * 0.5

    feature_frac = 4          # param_dict[layer.top + '_frac']
    bitwidth = 8

    cases = [
        ("full", x0, x1, True),
        ("per-channel", x0, x1_chan, True),
        ("scalar", x0, x1_scalar, True),
        ("no-quant", x0, x1, False),
    ]
    for name, a, b, qo in cases:
        out = quantized_scale_by_tensor(a, b, feature_frac, bitwidth=bitwidth,
                                        quant_output=qo)
        out = jax.block_until_ready(out)
        ref = _reference(a, b, feature_frac, bitwidth=bitwidth, quant_output=qo)
        assert out.shape == ref.shape, name
        assert out.dtype == ref.dtype, name
        # exact comparison: kernel and reference perform identical f32 mul / floor /
        # clip / power-of-two scaling, so the fake-quantized values match bit-for-bit
        assert bool(jnp.array_equal(out, ref)), f"mismatch vs reference: {name}"

    print("KERNEL_OK")
</pallas_src>

<mosaic_0001>
module attributes {stable_mosaic.version = 11 : i64} {
  func.func @kernel(%arg0: i32, %arg1: memref<4xf32, #tpu.memory_space<smem>>, %arg2: memref<1x2048xf32, #tpu.memory_space<vmem>>, %arg3: memref<1x2048xf32, #tpu.memory_space<vmem>>, %arg4: memref<1x2048xf32, #tpu.memory_space<vmem>>) attributes {dimension_semantics = [#tpu.dimension_semantics<parallel>], iteration_bounds = array<i64: 1>, scalar_prefetch = 0 : i64, scratch_operands = 0 : i64, tpu.core_type = #tpu.core_type<tc>, window_params = [{transform_indices = @transform_0, window_bounds = array<i64: 4>}, {transform_indices = @transform_1, window_bounds = array<i64: 1, 2048>}, {transform_indices = @transform_2, window_bounds = array<i64: 1, 2048>}, {transform_indices = @transform_3, window_bounds = array<i64: 1, 2048>}]} {
    %c0 = arith.constant 0 : index
    %c0_0 = arith.constant 0 : index
    %0 = vector.load %arg2[%c0, %c0_0] : memref<1x2048xf32, #tpu.memory_space<vmem>>, vector<1x2048xf32>
    %c0_1 = arith.constant 0 : index
    %c0_2 = arith.constant 0 : index
    %1 = vector.load %arg3[%c0_1, %c0_2] : memref<1x2048xf32, #tpu.memory_space<vmem>>, vector<1x2048xf32>
    %2 = arith.mulf %0, %1 : vector<1x2048xf32>
    %c0_3 = arith.constant 0 : index
    %3 = memref.load %arg1[%c0_3] : memref<4xf32, #tpu.memory_space<smem>>
    %c1 = arith.constant 1 : index
    %4 = memref.load %arg1[%c1] : memref<4xf32, #tpu.memory_space<smem>>
    %c2 = arith.constant 2 : index
    %5 = memref.load %arg1[%c2] : memref<4xf32, #tpu.memory_space<smem>>
    %c3 = arith.constant 3 : index
    %6 = memref.load %arg1[%c3] : memref<4xf32, #tpu.memory_space<smem>>
    %7 = vector.broadcast %3 : f32 to vector<1x2048xf32>
    %8 = arith.mulf %2, %7 : vector<1x2048xf32>
    %9 = math.floor %8 : vector<1x2048xf32>
    %10 = vector.broadcast %5 : f32 to vector<1x2048xf32>
    %11 = arith.maximumf %10, %9 : vector<1x2048xf32>
    %12 = vector.broadcast %6 : f32 to vector<1x2048xf32>
    %13 = arith.minimumf %12, %11 : vector<1x2048xf32>
    %14 = vector.broadcast %4 : f32 to vector<1x2048xf32>
    %15 = arith.mulf %13, %14 : vector<1x2048xf32>
    %c0_4 = arith.constant 0 : index
    %c0_5 = arith.constant 0 : index
    %16 = vector.load %arg4[%c0_4, %c0_5] : memref<1x2048xf32, #tpu.memory_space<vmem>>, vector<1x2048xf32>
    tpu.vector_store %arg4[%c0_4, %c0_5], %15 {strides = array<i32>} : memref<1x2048xf32, #tpu.memory_space<vmem>>, vector<1x2048xf32>,
    return
  }
  func.func @transform_0(%arg0: i32) -> i32 {
    %c0_i32 = arith.constant 0 : i32
    %c0_i32_0 = arith.constant 0 : i32
    return %c0_i32 : i32
  }
  func.func @transform_1(%arg0: i32) -> (i32, i32) {
    %c0_i32 = arith.constant 0 : i32
    %c0_i32_0 = arith.constant 0 : i32
    return %arg0, %c0_i32 : i32, i32
  }
  func.func @transform_2(%arg0: i32) -> (i32, i32) {
    %c0_i32 = arith.constant 0 : i32
    %c0_i32_0 = arith.constant 0 : i32
    return %arg0, %c0_i32 : i32, i32
  }
  func.func @transform_3(%arg0: i32) -> (i32, i32) {
    %c0_i32 = arith.constant 0 : i32
    %c0_i32_0 = arith.constant 0 : i32
    return %arg0, %c0_i32 : i32, i32
  }
}

</mosaic_0001>

<bundles_post_ra>
// kernel: tpu_custom_call.1
= control target key start
LH: loop header
LB: loop body
LE: loop exit
PB: predicated region body
PF: predicated region fallthrough
CT: control target
= control target key end

     0   :  { %8 = vsyncpa [#allocation5], 0  ;;  %s236_s0 = inlined_call_operand.hbm [shape: f32[4], index: 0, kind: input, shape index: {}]   ;;  %s237_s1 = inlined_call_operand.hbm [shape: f32[1,2048], index: 1, kind: input, shape index: {}]   ;;  %s238_s2 = inlined_call_operand.hbm [shape: f32[1,2048], index: 2, kind: input, shape index: {}]   ;;  %s239_s3 = inlined_call_operand.hbm [shape: f32[1,2048], index: 3, kind: output, shape index: {}]  }
   0x1   :  { %9 = vsyncpa [#allocation3], 0 }
   0x2   :  { %10 = vsyncpa [#allocation8], 0 }
   0x3   :  { %11 = vsyncpa [#allocation4], 0  ;;  %s17_s14 = sshll.u32 %s236_s0, 4  ;;  %s26_s17 = sshll.u32 %s237_s1, 4  ;;  %s18_s14 = int_to_ptr.hbm [resolvable:$true] %s17_s14  ;;  %s27_s17 = int_to_ptr.hbm [resolvable:$true] %s26_s17 }
   0x4   :  { %s200_s18 = smov [#allocation2]   ;;  %s201_s19 = smov [#allocation6]  }
   0x5   :  { %20 = dma.hbm_to_smem %s18_s14, 16, %s200_s18, [#allocation5]  }
   0x6   :  { %s28_s20 = sshll.u32 %s201_s19, 4  ;;  %s37_s23 = sshll.u32 %s238_s2, 4  ;;  %s29_s20 = int_to_ptr.vmem [resolvable:$true] %s28_s20  ;;  %s38_s23 = int_to_ptr.hbm [resolvable:$true] %s37_s23 }
   0x7   :  { %31 = dma.hbm_to_vmem [thread:$0]  %s27_s17, 256, %s29_s20, [#allocation3]  }
   0x8   :  { %s202_s24 = smov [#allocation7]  }
   0x9   :  { %s39_s25 = sshll.u32 %s202_s24, 4  ;;  %s40_s25 = int_to_ptr.vmem [resolvable:$true] %s39_s25 }
   0xa   :  { %42 = dma.hbm_to_vmem [thread:$0]  %s38_s23, 256, %s40_s25, [#allocation8]  }
   0xb   :  { %192 = dma.done.wait [#allocation5], 16  }
   0xc   :  { %193 = vsyncadd [#allocation5], 4294967280 }
   0xd   :  { %194 = dma.done.wait [#allocation3], 256  }
   0xe   :  { %195 = vsyncadd [#allocation3], 4294967040 }
   0xf   :  { %196 = dma.done.wait [#allocation8], 256  }
  0x10   :  { %197 = vsyncadd [#allocation8], 4294967040 }
  0x11   :  { %55 = sfence }
  0x12   :  { %v56_v0 = vld [vmem:[#allocation6] sm:$0xff]  ;;  %v58_v1 = vld [vmem:[#allocation7] sm:$0xff]  ;;  %s62_s0 = sld [smem:[#allocation2]]  ;;  %v57_v2 = vld [vmem:[#allocation6 + $0x8] sm:$0xff]  ;;  %s203_s27 = smov [#allocation9]  }
  0x13   :  { %v59_v3 = vld [vmem:[#allocation7 + $0x8] sm:$0xff]  ;;  %s102_s1 = sld [smem:[#allocation2 + $0x2]]  ;;  %v60_v4 = vmul.f32 %v58_v1, %v56_v0  ;;  %s87_s28 = sshll.u32 %s203_s27, 4  ;;  %s88_s28 = int_to_ptr.vmem [resolvable:$true] %s87_s28 }
  0x14   :  { %s103_s2 = sld [smem:[#allocation2 + $0x3]]  ;;  %v61_v5 = vmul.f32 %v59_v3, %v57_v2  ;;  %s89_s4 = sshll.u32 %s239_s3, 4  ;;  %s90_s4 = int_to_ptr.hbm [resolvable:$true] %s89_s4 }
  0x15   :  { %s101_s26 = sld [smem:[#allocation2 + $0x1]] }
  0x18   :  { %v66_v6 = vstv %s62_s0 }
  0x19   :  { %v67_v7 = vmul.f32 %v66_v6, %v60_v4  ;;  %v68_v8 = vmul.f32 %v66_v6, %v61_v5  ;;  %v71_v9 = vstv %s102_s1 }
  0x1a   :  { %v74_v12 = vstv %s103_s2 }
  0x1b   :  { %v69_v10 = vfloor.f32 %v67_v7  ;;  %v70_v11 = vfloor.f32 %v68_v8  ;;  %v77_v15 = vstv %s101_s26 }
  0x1d   :  { %v72_v13 = vmax.f32 %v71_v9, %v69_v10  ;;  %v73_v14 = vmax.f32 %v71_v9, %v70_v11 }
  0x1f   :  { %v75_v16 = vmin.f32 %v74_v12, %v72_v13  ;;  %v76_v17 = vmin.f32 %v74_v12, %v73_v14 }
  0x21   :  { %v78_v18 = vmul.f32 %v77_v15, %v75_v16  ;;  %v79_v19 = vmul.f32 %v77_v15, %v76_v17 }
  0x23   :  { %80 = vst [vmem:[#allocation9] sm:$0xff] %v78_v18 }
  0x24   :  { %81 = vst [vmem:[#allocation9 + $0x8] sm:$0xff] %v79_v19 }
  0x25   :  { %92 = dma.vmem_to_hbm [thread:$0]  %s88_s28, 256, %s90_s4, [#allocation4]  }
  0x26   :  { %198 = dma.done.wait [#allocation4], 256  }
  0x27   :  { %199 = vsyncadd [#allocation4], 4294967040 }
  0x28   :  { %97 = vsyncpa [#allocation3], 1 }
  0x29   :  { %98 = vsyncpa [#allocation8], 1 }
  0x2a   :  { %99 = vsyncpa [#allocation4], 1 }
  0x2b   :  { %100 = vsyncpa [#allocation5], 1 }

</bundles_post_ra>
